<compile_context>
chip_gen: v7x
topology: tpu7x:2x2x1
jax: 0.10.0
libtpu: 0.0.40
codegen_flags: <defaults>
</compile_context>

<pallas_src>
import jax
import jax.numpy as jnp
from jax.experimental import pallas as pl
from jax.experimental.pallas import tpu as pltpu


def _round_up(v, m):
    return ((v + m - 1) // m) * m


def _dist_estimate_kernel(x_ref, w1_ref, b1_ref, w2_ref, b2_ref, w3_ref, b3_ref,
                          mu_ref, sigma_ref):
    # Matmuls on bf16 operands (MXU native); accumulation + all elementwise math in f32.
    x = x_ref[...].astype(jnp.bfloat16)

    h1 = jnp.dot(x, w1_ref[...], preferred_element_type=jnp.float32) + b1_ref[...]
    h1 = jnp.maximum(h1, 0.0)                                     # ReLU

    h2 = jnp.dot(h1.astype(jnp.bfloat16), w2_ref[...],
                 preferred_element_type=jnp.float32) + b2_ref[...]
    h2 = jnp.maximum(h2, 0.0)                                     # ReLU

    p = jnp.dot(h2.astype(jnp.bfloat16), w3_ref[...],
                preferred_element_type=jnp.float32) + b3_ref[...]

    op = mu_ref.shape[1]              # static, multiple of 128 -> aligned lane slices
    mu = p[:, :op]
    s = p[:, op:]
    # Numerically-stable softplus + 1e-7 floor (EUP work, hidden under the matmul chain).
    sigma = jnp.maximum(s, 0.0) + jnp.log1p(jnp.exp(-jnp.abs(s))) + 1e-7

    mu_ref[...] = mu.astype(mu_ref.dtype)
    sigma_ref[...] = sigma.astype(sigma_ref.dtype)


def _vmem_limit_bytes():
    # ~3/4 of physical VMEM: ~48 MiB on v7x (64 MiB), capped at 96 MiB on v5e/v6e (128 MiB).
    try:
        cap = pltpu.get_tpu_info().vmem_capacity_bytes
    except Exception:                 # API unavailable -> assume 128 MiB generation
        cap = 128 * 1024 * 1024
    return int(min(cap * 3 // 4, 96 * 1024 * 1024))


def _pick_tile_rows(B, x_dim, hp, op2, vmem_limit):
    """Largest sublane-aligned batch tile whose padded working set fits the VMEM budget."""
    # Resident, single-buffered bf16 weights + f32 biases.
    weight_bytes = 2 * (x_dim * hp + hp * hp + hp * op2) + 4 * (2 * hp + op2)
    # Per row: x tile (f32, double-buffered) + its bf16 copy, h1/h2 in f32 + bf16,
    # the merged params row in f32, and the two f32 outputs (double-buffered).
    per_row = (2 * 4 + 2) * x_dim + 2 * (4 + 2) * hp + 4 * op2 + 2 * 2 * 4 * (op2 // 2)
    budget = max(vmem_limit - weight_bytes - (4 << 20), per_row * 64)
    rows = int(min(2048, budget // per_row))
    tm = min(rows, B)
    if B > 64:                        # >= 2 grid steps so v7x megacore can split the batch
        tm = min(tm, pl.cdiv(B, 2))
    if tm < B:                        # block rows must be a multiple of 8 unless == B
        tm = max(8, (tm // 8) * 8)
    return tm


def _resident_spec(shape):
    # Constant index_map -> block never changes; single-buffer it to halve its VMEM use.
    try:
        return pl.BlockSpec(shape, lambda i: (0, 0), pipeline_mode=pl.Buffered(1))
    except (TypeError, AttributeError):   # older JAX without pipeline_mode / Buffered
        return pl.BlockSpec(shape, lambda i: (0, 0))


def dist_estimate(x, w1, b1, w2, b2, w3, b3, out_dim):
    """3-layer MLP head; returns (mu, sigma) of Independent(Normal(mu, sigma), 1) in f32.

    Weights are stored pre-transposed as [in_dim, out_dim] (y = x @ W + b)."""
    B, x_dim = x.shape
    hidden = w1.shape[1]
    assert w2.shape == (hidden, hidden) and w3.shape == (hidden, 2 * out_dim)

    f32, bf16 = jnp.float32, jnp.bfloat16
    hp = _round_up(hidden, 128)       # padded hidden width
    op = _round_up(out_dim, 128)      # padded mu / sigma width (each)

    # Zero-pad weight/bias lane dims to 128-multiples (x stays unpadded: its lane dim only
    # feeds the first matmul's K and padding it would cost an extra HBM round-trip).
    w1p = jnp.pad(w1.astype(bf16), ((0, 0), (0, hp - hidden)))
    b1p = jnp.pad(b1.reshape(1, hidden).astype(f32), ((0, 0), (0, hp - hidden)))
    w2p = jnp.pad(w2.astype(bf16), ((0, hp - hidden), (0, hp - hidden)))
    b2p = jnp.pad(b2.reshape(1, hidden).astype(f32), ((0, 0), (0, hp - hidden)))
    # Layout of layer-3 columns: [mu-block (op lanes) | sigma-block (op lanes)].
    w3p = jnp.concatenate(
        [jnp.pad(w3[:, :out_dim].astype(bf16), ((0, hp - hidden), (0, op - out_dim))),
         jnp.pad(w3[:, out_dim:].astype(bf16), ((0, hp - hidden), (0, op - out_dim)))],
        axis=1)
    b3p = jnp.concatenate(
        [jnp.pad(b3[:out_dim].reshape(1, -1).astype(f32), ((0, 0), (0, op - out_dim))),
         jnp.pad(b3[out_dim:].reshape(1, -1).astype(f32), ((0, 0), (0, op - out_dim)))],
        axis=1)

    vmem_limit = _vmem_limit_bytes()
    tm = _pick_tile_rows(B, x_dim, hp, 2 * op, vmem_limit)
    grid = (pl.cdiv(B, tm),)

    out_shape = (jax.ShapeDtypeStruct((B, op), f32),          # mu  (lane-dense, padded)
                 jax.ShapeDtypeStruct((B, op), f32))          # sigma (lane-dense, padded)
    out_specs = (pl.BlockSpec((tm, op), lambda i: (i, 0)),
                 pl.BlockSpec((tm, op), lambda i: (i, 0)))

    def _call(resident):
        return pl.pallas_call(
            _dist_estimate_kernel,
            out_shape=out_shape,
            grid=grid,
            in_specs=[
                pl.BlockSpec((tm, x_dim), lambda i: (i, 0)),  # batch-tiled activations
                resident((x_dim, hp)), resident((1, hp)),     # resident weights / biases
                resident((hp, hp)), resident((1, hp)),
                resident((hp, 2 * op)), resident((1, 2 * op)),
            ],
            out_specs=out_specs,
            compiler_params=pltpu.CompilerParams(
                dimension_semantics=("parallel",),            # shard batch over TCs (v7x)
                vmem_limit_bytes=vmem_limit,
            ),
        )(x, w1p, b1p, w2p, b2p, w3p, b3p)

    try:
        mu_p, sigma_p = _call(_resident_spec)                 # single-buffered weights
    except Exception:
        # Fallback: default double-buffered resident blocks (if Buffered(1) won't lower).
        mu_p, sigma_p = _call(lambda shape: pl.BlockSpec(shape, lambda i: (0, 0)))

    # Un-pad.  These slices are no-ops when out_dim is already a multiple of 128; if the
    # consumer is jitted alongside, XLA fuses them into the next op.
    return mu_p[:, :out_dim], sigma_p[:, :out_dim]


def _init_params(key, x_dim, hidden_dim, out_dim, dtype=jnp.float32):
    """Deterministic synthetic params (kaiming-uniform-ish scale), stored [in, out]."""
    ks = jax.random.split(key, 6)

    def lin(kw, kb, fan_in, fan_out):
        bound = 1.0 / jnp.sqrt(fan_in)
        w = jax.random.uniform(kw, (fan_in, fan_out), dtype, -bound, bound)
        b = jax.random.uniform(kb, (fan_out,), dtype, -bound, bound)
        return w, b

    w1, b1 = lin(ks[0], ks[1], x_dim, hidden_dim)
    w2, b2 = lin(ks[2], ks[3], hidden_dim, hidden_dim)
    w3, b3 = lin(ks[4], ks[5], hidden_dim, 2 * out_dim)
    return w1, b1, w2, b2, w3, b3


def _reference_f32(x, w1, b1, w2, b2, w3, b3, out_dim):
    h1 = jax.nn.relu(x @ w1 + b1)
    h2 = jax.nn.relu(h1 @ w2 + b2)
    params = h2 @ w3 + b3
    mu = params[:, :out_dim]
    sigma = jax.nn.softplus(params[:, out_dim:]) + 1e-7
    return mu, sigma


def _reference_bf16(x, w1, b1, w2, b2, w3, b3, out_dim):
    bf = jnp.bfloat16
    dot = lambda a, b: jnp.dot(a.astype(bf), b.astype(bf),
                               preferred_element_type=jnp.float32)
    h1 = jax.nn.relu(dot(x, w1) + b1)
    h2 = jax.nn.relu(dot(h1, w2) + b2)
    params = dot(h2, w3) + b3
    mu = params[:, :out_dim]
    sigma = jax.nn.softplus(params[:, out_dim:]) + 1e-7
    return mu, sigma


if __name__ == "__main__":
    # Small shapes consistent with the module: x is [batch, x_dim].
    batch, x_dim, hidden_dim, out_dim = 8, 32, 32, 16

    key = jax.random.PRNGKey(0)
    k_x, k_p = jax.random.split(key)
    x = jax.random.normal(k_x, (batch, x_dim), jnp.float32)
    w1, b1, w2, b2, w3, b3 = _init_params(k_p, x_dim, hidden_dim, out_dim)

    mu, sigma = dist_estimate(x, w1, b1, w2, b2, w3, b3, out_dim)
    jax.block_until_ready((mu, sigma))

    assert mu.shape == (batch, out_dim) and sigma.shape == (batch, out_dim)

    # Tight check against a reference mirroring the bf16-operand / f32-accum matmuls.
    mu_bf, sigma_bf = _reference_bf16(x, w1, b1, w2, b2, w3, b3, out_dim)
    assert jnp.allclose(mu, mu_bf, atol=1e-3, rtol=1e-3)
    assert jnp.allclose(sigma, sigma_bf, atol=1e-3, rtol=1e-3)

    # Loose check against the pure-f32 module semantics (bf16 matmul rounding only).
    mu_f32, sigma_f32 = _reference_f32(x, w1, b1, w2, b2, w3, b3, out_dim)
    assert jnp.allclose(mu, mu_f32, atol=5e-2, rtol=5e-2)
    assert jnp.allclose(sigma, sigma_f32, atol=5e-2, rtol=5e-2)
    assert bool(jnp.all(sigma > 0))   # valid Normal scale

    # The Independent(Normal(mu, sigma), 1) distribution object itself has no tensor
    # compute; the kernel returns its defining parameters (mu, sigma).
    print("KERNEL_OK")
</pallas_src>

<mosaic_0001>
module attributes {stable_mosaic.version = 11 : i64} {
  func.func @_dist_estimate_kernel(%arg0: i32, %arg1: memref<8x32xf32, #tpu.memory_space<vmem>>, %arg2: memref<32x128xbf16, #tpu.memory_space<vmem>>, %arg3: memref<1x128xf32, #tpu.memory_space<vmem>>, %arg4: memref<128x128xbf16, #tpu.memory_space<vmem>>, %arg5: memref<1x128xf32, #tpu.memory_space<vmem>>, %arg6: memref<128x256xbf16, #tpu.memory_space<vmem>>, %arg7: memref<1x256xf32, #tpu.memory_space<vmem>>, %arg8: memref<8x128xf32, #tpu.memory_space<vmem>>, %arg9: memref<8x128xf32, #tpu.memory_space<vmem>>) attributes {dimension_semantics = [#tpu.dimension_semantics<parallel>], iteration_bounds = array<i64: 1>, scalar_prefetch = 0 : i64, scratch_operands = 0 : i64, tpu.core_type = #tpu.core_type<tc>, window_params = [{transform_indices = @transform_0, window_bounds = array<i64: 8, 32>}, {pipeline_mode = #tpu.pipeline_mode<synchronous>, transform_indices = @transform_1, window_bounds = array<i64: 32, 128>}, {pipeline_mode = #tpu.pipeline_mode<synchronous>, transform_indices = @transform_2, window_bounds = array<i64: 1, 128>}, {pipeline_mode = #tpu.pipeline_mode<synchronous>, transform_indices = @transform_3, window_bounds = array<i64: 128, 128>}, {pipeline_mode = #tpu.pipeline_mode<synchronous>, transform_indices = @transform_4, window_bounds = array<i64: 1, 128>}, {pipeline_mode = #tpu.pipeline_mode<synchronous>, transform_indices = @transform_5, window_bounds = array<i64: 128, 256>}, {pipeline_mode = #tpu.pipeline_mode<synchronous>, transform_indices = @transform_6, window_bounds = array<i64: 1, 256>}, {transform_indices = @transform_7, window_bounds = array<i64: 8, 128>}, {transform_indices = @transform_8, window_bounds = array<i64: 8, 128>}]} {
    %c0 = arith.constant 0 : index
    %c0_0 = arith.constant 0 : index
    %0 = vector.load %arg1[%c0, %c0_0] : memref<8x32xf32, #tpu.memory_space<vmem>>, vector<8x32xf32>
    %1 = arith.truncf %0 : vector<8x32xf32> to vector<8x32xbf16>
    %c0_1 = arith.constant 0 : index
    %c0_2 = arith.constant 0 : index
    %2 = vector.load %arg2[%c0_1, %c0_2] : memref<32x128xbf16, #tpu.memory_space<vmem>>, vector<32x128xbf16>
    %cst = arith.constant dense<0.000000e+00> : vector<8x128xf32>
    %3 = tpu.matmul %1, %2, %cst {dimension_numbers = #tpu.dot_dimension_numbers<[1], [0], [0], [1], [0, 0, 1, 1], [], []>} : vector<8x32xbf16>, vector<32x128xbf16>, vector<8x128xf32> -> vector<8x128xf32>
    %c0_3 = arith.constant 0 : index
    %c0_4 = arith.constant 0 : index
    %4 = vector.load %arg3[%c0_3, %c0_4] : memref<1x128xf32, #tpu.memory_space<vmem>>, vector<1x128xf32>
    %5 = vector.broadcast %4 : vector<1x128xf32> to vector<8x128xf32>
    %6 = arith.addf %3, %5 : vector<8x128xf32>
    %cst_5 = arith.constant 0.000000e+00 : f32
    %7 = vector.broadcast %cst_5 : f32 to vector<8x128xf32>
    %8 = arith.maximumf %6, %7 : vector<8x128xf32>
    %9 = arith.truncf %8 : vector<8x128xf32> to vector<8x128xbf16>
    %c0_6 = arith.constant 0 : index
    %c0_7 = arith.constant 0 : index
    %10 = vector.load %arg4[%c0_6, %c0_7] : memref<128x128xbf16, #tpu.memory_space<vmem>>, vector<128x128xbf16>
    %cst_8 = arith.constant dense<0.000000e+00> : vector<8x128xf32>
    %11 = tpu.matmul %9, %10, %cst_8 {dimension_numbers = #tpu.dot_dimension_numbers<[1], [0], [0], [1], [0, 0, 1, 1], [], []>} : vector<8x128xbf16>, vector<128x128xbf16>, vector<8x128xf32> -> vector<8x128xf32>
    %c0_9 = arith.constant 0 : index
    %c0_10 = arith.constant 0 : index
    %12 = vector.load %arg5[%c0_9, %c0_10] : memref<1x128xf32, #tpu.memory_space<vmem>>, vector<1x128xf32>
    %13 = vector.broadcast %12 : vector<1x128xf32> to vector<8x128xf32>
    %14 = arith.addf %11, %13 : vector<8x128xf32>
    %cst_11 = arith.constant 0.000000e+00 : f32
    %15 = vector.broadcast %cst_11 : f32 to vector<8x128xf32>
    %16 = arith.maximumf %14, %15 : vector<8x128xf32>
    %17 = arith.truncf %16 : vector<8x128xf32> to vector<8x128xbf16>
    %c0_12 = arith.constant 0 : index
    %c0_13 = arith.constant 0 : index
    %18 = vector.load %arg6[%c0_12, %c0_13] : memref<128x256xbf16, #tpu.memory_space<vmem>>, vector<128x256xbf16>
    %cst_14 = arith.constant dense<0.000000e+00> : vector<8x256xf32>
    %19 = tpu.matmul %17, %18, %cst_14 {dimension_numbers = #tpu.dot_dimension_numbers<[1], [0], [0], [1], [0, 0, 1, 1], [], []>} : vector<8x128xbf16>, vector<128x256xbf16>, vector<8x256xf32> -> vector<8x256xf32>
    %c0_15 = arith.constant 0 : index
    %c0_16 = arith.constant 0 : index
    %20 = vector.load %arg7[%c0_15, %c0_16] : memref<1x256xf32, #tpu.memory_space<vmem>>, vector<1x256xf32>
    %21 = vector.broadcast %20 : vector<1x256xf32> to vector<8x256xf32>
    %22 = arith.addf %19, %21 : vector<8x256xf32>
    %23 = vector.extract_strided_slice %22 {offsets = [0, 0], sizes = [8, 128], strides = [1, 1]} : vector<8x256xf32> to vector<8x128xf32>
    %24 = vector.extract_strided_slice %22 {offsets = [0, 128], sizes = [8, 128], strides = [1, 1]} : vector<8x256xf32> to vector<8x128xf32>
    %cst_17 = arith.constant 0.000000e+00 : f32
    %25 = vector.broadcast %cst_17 : f32 to vector<8x128xf32>
    %26 = arith.maximumf %24, %25 : vector<8x128xf32>
    %27 = math.absf %24 : vector<8x128xf32>
    %cst_18 = arith.constant 0.000000e+00 : f32
    %28 = vector.broadcast %cst_18 : f32 to vector<8x128xf32>
    %29 = arith.subf %28, %27 : vector<8x128xf32>
    %30 = math.exp %29 : vector<8x128xf32>
    %31 = math.log1p %30 : vector<8x128xf32>
    %32 = arith.addf %26, %31 : vector<8x128xf32>
    %cst_19 = arith.constant 1.000000e-07 : f32
    %33 = vector.broadcast %cst_19 : f32 to vector<8x128xf32>
    %34 = arith.addf %32, %33 : vector<8x128xf32>
    %c0_20 = arith.constant 0 : index
    %c0_21 = arith.constant 0 : index
    %35 = vector.load %arg8[%c0_20, %c0_21] : memref<8x128xf32, #tpu.memory_space<vmem>>, vector<8x128xf32>
    tpu.vector_store %arg8[%c0_20, %c0_21], %23 {strides = array<i32>} : memref<8x128xf32, #tpu.memory_space<vmem>>, vector<8x128xf32>,
    %c0_22 = arith.constant 0 : index
    %c0_23 = arith.constant 0 : index
    %36 = vector.load %arg9[%c0_22, %c0_23] : memref<8x128xf32, #tpu.memory_space<vmem>>, vector<8x128xf32>
    tpu.vector_store %arg9[%c0_22, %c0_23], %34 {strides = array<i32>} : memref<8x128xf32, #tpu.memory_space<vmem>>, vector<8x128xf32>,
    return
  }
  func.func @transform_0(%arg0: i32) -> (i32, i32) {
    %c0_i32 = arith.constant 0 : i32
    %c0_i32_0 = arith.constant 0 : i32
    return %arg0, %c0_i32 : i32, i32
  }
  func.func @transform_1(%arg0: i32) -> (i32, i32) {
    %c0_i32 = arith.constant 0 : i32
    %c0_i32_0 = arith.constant 0 : i32
    %c0_i32_1 = arith.constant 0 : i32
    return %c0_i32, %c0_i32_0 : i32, i32
  }
  func.func @transform_2(%arg0: i32) -> (i32, i32) {
    %c0_i32 = arith.constant 0 : i32
    %c0_i32_0 = arith.constant 0 : i32
    %c0_i32_1 = arith.constant 0 : i32
    return %c0_i32, %c0_i32_0 : i32, i32
  }
  func.func @transform_3(%arg0: i32) -> (i32, i32) {
    %c0_i32 = arith.constant 0 : i32
    %c0_i32_0 = arith.constant 0 : i32
    %c0_i32_1 = arith.constant 0 : i32
    return %c0_i32, %c0_i32_0 : i32, i32
  }
  func.func @transform_4(%arg0: i32) -> (i32, i32) {
    %c0_i32 = arith.constant 0 : i32
    %c0_i32_0 = arith.constant 0 : i32
    %c0_i32_1 = arith.constant 0 : i32
    return %c0_i32, %c0_i32_0 : i32, i32
  }
  func.func @transform_5(%arg0: i32) -> (i32, i32) {
    %c0_i32 = arith.constant 0 : i32
    %c0_i32_0 = arith.constant 0 : i32
    %c0_i32_1 = arith.constant 0 : i32
    return %c0_i32, %c0_i32_0 : i32, i32
  }
  func.func @transform_6(%arg0: i32) -> (i32, i32) {
    %c0_i32 = arith.constant 0 : i32
    %c0_i32_0 = arith.constant 0 : i32
    %c0_i32_1 = arith.constant 0 : i32
    return %c0_i32, %c0_i32_0 : i32, i32
  }
  func.func @transform_7(%arg0: i32) -> (i32, i32) {
    %c0_i32 = arith.constant 0 : i32
    %c0_i32_0 = arith.constant 0 : i32
    return %arg0, %c0_i32 : i32, i32
  }
  func.func @transform_8(%arg0: i32) -> (i32, i32) {
    %c0_i32 = arith.constant 0 : i32
    %c0_i32_0 = arith.constant 0 : i32
    return %arg0, %c0_i32 : i32, i32
  }
}

module attributes {stable_mosaic.version = 11 : i64} {
  func.func @_dist_estimate_kernel(%arg0: i32, %arg1: memref<8x32xf32, #tpu.memory_space<vmem>>, %arg2: memref<32x128xbf16, #tpu.memory_space<vmem>>, %arg3: memref<1x128xf32, #tpu.memory_space<vmem>>, %arg4: memref<128x128xbf16, #tpu.memory_space<vmem>>, %arg5: memref<1x128xf32, #tpu.memory_space<vmem>>, %arg6: memref<128x256xbf16, #tpu.memory_space<vmem>>, %arg7: memref<1x256xf32, #tpu.memory_space<vmem>>, %arg8: memref<8x128xf32, #tpu.memory_space<vmem>>, %arg9: memref<8x128xf32, #tpu.memory_space<vmem>>) attributes {dimension_semantics = [#tpu.dimension_semantics<parallel>], iteration_bounds = array<i64: 1>, scalar_prefetch = 0 : i64, scratch_operands = 0 : i64, tpu.core_type = #tpu.core_type<tc>, window_params = [{transform_indices = @transform_0, window_bounds = array<i64: 8, 32>}, {pipeline_mode = #tpu.pipeline_mode<synchronous>, transform_indices = @transform_1, window_bounds = array<i64: 32, 128>}, {pipeline_mode = #tpu.pipeline_mode<synchronous>, transform_indices = @transform_2, window_bounds = array<i64: 1, 128>}, {pipeline_mode = #tpu.pipeline_mode<synchronous>, transform_indices = @transform_3, window_bounds = array<i64: 128, 128>}, {pipeline_mode = #tpu.pipeline_mode<synchronous>, transform_indices = @transform_4, window_bounds = array<i64: 1, 128>}, {pipeline_mode = #tpu.pipeline_mode<synchronous>, transform_indices = @transform_5, window_bounds = array<i64: 128, 256>}, {pipeline_mode = #tpu.pipeline_mode<synchronous>, transform_indices = @transform_6, window_bounds = array<i64: 1, 256>}, {transform_indices = @transform_7, window_bounds = array<i64: 8, 128>}, {transform_indices = @transform_8, window_bounds = array<i64: 8, 128>}]} {
    %c0 = arith.constant 0 : index
    %c0_0 = arith.constant 0 : index
    %0 = vector.load %arg1[%c0, %c0_0] : memref<8x32xf32, #tpu.memory_space<vmem>>, vector<8x32xf32>
    %1 = arith.truncf %0 : vector<8x32xf32> to vector<8x32xbf16>
    %c0_1 = arith.constant 0 : index
    %c0_2 = arith.constant 0 : index
    %2 = vector.load %arg2[%c0_1, %c0_2] : memref<32x128xbf16, #tpu.memory_space<vmem>>, vector<32x128xbf16>
    %cst = arith.constant dense<0.000000e+00> : vector<8x128xf32>
    %3 = tpu.matmul %1, %2, %cst {dimension_numbers = #tpu.dot_dimension_numbers<[1], [0], [0], [1], [0, 0, 1, 1], [], []>} : vector<8x32xbf16>, vector<32x128xbf16>, vector<8x128xf32> -> vector<8x128xf32>
    %c0_3 = arith.constant 0 : index
    %c0_4 = arith.constant 0 : index
    %4 = vector.load %arg3[%c0_3, %c0_4] : memref<1x128xf32, #tpu.memory_space<vmem>>, vector<1x128xf32>
    %5 = vector.broadcast %4 : vector<1x128xf32> to vector<8x128xf32>
    %6 = arith.addf %3, %5 : vector<8x128xf32>
    %cst_5 = arith.constant 0.000000e+00 : f32
    %7 = vector.broadcast %cst_5 : f32 to vector<8x128xf32>
    %8 = arith.maximumf %6, %7 : vector<8x128xf32>
    %9 = arith.truncf %8 : vector<8x128xf32> to vector<8x128xbf16>
    %c0_6 = arith.constant 0 : index
    %c0_7 = arith.constant 0 : index
    %10 = vector.load %arg4[%c0_6, %c0_7] : memref<128x128xbf16, #tpu.memory_space<vmem>>, vector<128x128xbf16>
    %cst_8 = arith.constant dense<0.000000e+00> : vector<8x128xf32>
    %11 = tpu.matmul %9, %10, %cst_8 {dimension_numbers = #tpu.dot_dimension_numbers<[1], [0], [0], [1], [0, 0, 1, 1], [], []>} : vector<8x128xbf16>, vector<128x128xbf16>, vector<8x128xf32> -> vector<8x128xf32>
    %c0_9 = arith.constant 0 : index
    %c0_10 = arith.constant 0 : index
    %12 = vector.load %arg5[%c0_9, %c0_10] : memref<1x128xf32, #tpu.memory_space<vmem>>, vector<1x128xf32>
    %13 = vector.broadcast %12 : vector<1x128xf32> to vector<8x128xf32>
    %14 = arith.addf %11, %13 : vector<8x128xf32>
    %cst_11 = arith.constant 0.000000e+00 : f32
    %15 = vector.broadcast %cst_11 : f32 to vector<8x128xf32>
    %16 = arith.maximumf %14, %15 : vector<8x128xf32>
    %17 = arith.truncf %16 : vector<8x128xf32> to vector<8x128xbf16>
    %c0_12 = arith.constant 0 : index
    %c0_13 = arith.constant 0 : index
    %18 = vector.load %arg6[%c0_12, %c0_13] : memref<128x256xbf16, #tpu.memory_space<vmem>>, vector<128x256xbf16>
    %cst_14 = arith.constant dense<0.000000e+00> : vector<8x256xf32>
    %19 = tpu.matmul %17, %18, %cst_14 {dimension_numbers = #tpu.dot_dimension_numbers<[1], [0], [0], [1], [0, 0, 1, 1], [], []>} : vector<8x128xbf16>, vector<128x256xbf16>, vector<8x256xf32> -> vector<8x256xf32>
    %c0_15 = arith.constant 0 : index
    %c0_16 = arith.constant 0 : index
    %20 = vector.load %arg7[%c0_15, %c0_16] : memref<1x256xf32, #tpu.memory_space<vmem>>, vector<1x256xf32>
    %21 = vector.broadcast %20 : vector<1x256xf32> to vector<8x256xf32>
    %22 = arith.addf %19, %21 : vector<8x256xf32>
    %23 = vector.extract_strided_slice %22 {offsets = [0, 0], sizes = [8, 128], strides = [1, 1]} : vector<8x256xf32> to vector<8x128xf32>
    %24 = vector.extract_strided_slice %22 {offsets = [0, 128], sizes = [8, 128], strides = [1, 1]} : vector<8x256xf32> to vector<8x128xf32>
    %cst_17 = arith.constant 0.000000e+00 : f32
    %25 = vector.broadcast %cst_17 : f32 to vector<8x128xf32>
    %26 = arith.maximumf %24, %25 : vector<8x128xf32>
    %27 = math.absf %24 : vector<8x128xf32>
    %cst_18 = arith.constant 0.000000e+00 : f32
    %28 = vector.broadcast %cst_18 : f32 to vector<8x128xf32>
    %29 = arith.subf %28, %27 : vector<8x128xf32>
    %30 = math.exp %29 : vector<8x128xf32>
    %31 = math.log1p %30 : vector<8x128xf32>
    %32 = arith.addf %26, %31 : vector<8x128xf32>
    %cst_19 = arith.constant 1.000000e-07 : f32
    %33 = vector.broadcast %cst_19 : f32 to vector<8x128xf32>
    %34 = arith.addf %32, %33 : vector<8x128xf32>
    %c0_20 = arith.constant 0 : index
    %c0_21 = arith.constant 0 : index
    %35 = vector.load %arg8[%c0_20, %c0_21] : memref<8x128xf32, #tpu.memory_space<vmem>>, vector<8x128xf32>
    tpu.vector_store %arg8[%c0_20, %c0_21], %23 {strides = array<i32>} : memref<8x128xf32, #tpu.memory_space<vmem>>, vector<8x128xf32>,
    %c0_22 = arith.constant 0 : index
    %c0_23 = arith.constant 0 : index
    %36 = vector.load %arg9[%c0_22, %c0_23] : memref<8x128xf32, #tpu.memory_space<vmem>>, vector<8x128xf32>
    tpu.vector_store %arg9[%c0_22, %c0_23], %34 {strides = array<i32>} : memref<8x128xf32, #tpu.memory_space<vmem>>, vector<8x128xf32>,
    return
  }
  func.func @transform_0(%arg0: i32) -> (i32, i32) {
    %c0_i32 = arith.constant 0 : i32
    %c0_i32_0 = arith.constant 0 : i32
    return %arg0, %c0_i32 : i32, i32
  }
  func.func @transform_1(%arg0: i32) -> (i32, i32) {
    %c0_i32 = arith.constant 0 : i32
    %c0_i32_0 = arith.constant 0 : i32
    %c0_i32_1 = arith.constant 0 : i32
    return %c0_i32, %c0_i32_0 : i32, i32
  }
  func.func @transform_2(%arg0: i32) -> (i32, i32) {
    %c0_i32 = arith.constant 0 : i32
    %c0_i32_0 = arith.constant 0 : i32
    %c0_i32_1 = arith.constant 0 : i32
    return %c0_i32, %c0_i32_0 : i32, i32
  }
  func.func @transform_3(%arg0: i32) -> (i32, i32) {
    %c0_i32 = arith.constant 0 : i32
    %c0_i32_0 = arith.constant 0 : i32
    %c0_i32_1 = arith.constant 0 : i32
    return %c0_i32, %c0_i32_0 : i32, i32
  }
  func.func @transform_4(%arg0: i32) -> (i32, i32) {
    %c0_i32 = arith.constant 0 : i32
    %c0_i32_0 = arith.constant 0 : i32
    %c0_i32_1 = arith.constant 0 : i32
    return %c0_i32, %c0_i32_0 : i32, i32
  }
  func.func @transform_5(%arg0: i32) -> (i32, i32) {
    %c0_i32 = arith.constant 0 : i32
    %c0_i32_0 = arith.constant 0 : i32
    %c0_i32_1 = arith.constant 0 : i32
    return %c0_i32, %c0_i32_0 : i32, i32
  }
  func.func @transform_6(%arg0: i32) -> (i32, i32) {
    %c0_i32 = arith.constant 0 : i32
    %c0_i32_0 = arith.constant 0 : i32
    %c0_i32_1 = arith.constant 0 : i32
    return %c0_i32, %c0_i32_0 : i32, i32
  }
  func.func @transform_7(%arg0: i32) -> (i32, i32) {
    %c0_i32 = arith.constant 0 : i32
    %c0_i32_0 = arith.constant 0 : i32
    return %arg0, %c0_i32 : i32, i32
  }
  func.func @transform_8(%arg0: i32) -> (i32, i32) {
    %c0_i32 = arith.constant 0 : i32
    %c0_i32_0 = arith.constant 0 : i32
    return %arg0, %c0_i32 : i32, i32
  }
}

</mosaic_0001>

<bundles_post_ra>
// kernel: tpu_custom_call.1
= control target key start
LH: loop header
LB: loop body
LE: loop exit
PB: predicated region body
PF: predicated region fallthrough
CT: control target
= control target key end

     0   :  { %14 = vsyncpa [#allocation3], 0  ;;  %s1003_s0 = inlined_call_operand.hbm [shape: f32[8,32], index: 0, kind: input, shape index: {}]   ;;  %s1004_s1 = inlined_call_operand.hbm [shape: bf16[32,128], index: 1, kind: input, shape index: {}]   ;;  %s1005_s2 = inlined_call_operand.hbm [shape: f32[1,128], index: 2, kind: input, shape index: {}]   ;;  %s1006_s3 = inlined_call_operand.hbm [shape: bf16[128,128], index: 3, kind: input, shape index: {}]   ;;  %s1007_s4 = inlined_call_operand.hbm [shape: f32[1,128], index: 4, kind: input, shape index: {}]   ;;  %s1008_s5 = inlined_call_operand.hbm [shape: bf16[128,256], index: 5, kind: input, shape index: {}]   ;;  %s1009_s6 = inlined_call_operand.hbm [shape: f32[1,256], index: 6, kind: input, shape index: {}]   ;;  %s1010_s7 = inlined_call_operand.hbm [shape: f32[8,128], index: 7, kind: output, shape index: {0}]   ;;  %s1011_s8 = inlined_call_operand.hbm [shape: f32[8,128], index: 8, kind: output, shape index: {1}]  }
   0x1   :  { %15 = vsyncpa [#allocation6], 0 }
   0x2   :  { %16 = vsyncpa [#allocation9], 0 }
   0x3   :  { %17 = vsyncpa [#allocation12], 0 }
   0x4   :  { %18 = vsyncpa [#allocation4], 0 }
   0x5   :  { %19 = vsyncpa [#allocation16], 0  ;;  %s834_s27 = smov [#allocation5]   ;;  %s624_s9 = scalar_lea.hbm %s1004_s1, 256 }
   0x6   :  { %s35_s28 = sshll.u32 %s834_s27, 4  ;;  %p625_p0 = scmp.ne.s32.totalorder %s1004_s1, %s624_s9  ;;  %s36_s28 = int_to_ptr.vmem [resolvable:$true] %s35_s28 }
   0x7   :  { %p628_p1 = scmp.lt.u32.totalorder %s624_s9, %s1004_s1 }
   0x9   :  { %p630_p2 = pnand %p628_p1, %p625_p0 }
   0xb   :  { %633 = shalt.err (!%p630_p2)
}
   0xc   :  { %s634_s14 = scalar_lea.vmem %s36_s28, 256  ;;  %p639_p4 = scmp.lt.s32.totalorder %s36_s28, %s36_s28 }
   0xd   :  { %p635_p3 = scmp.ne.s32.totalorder %s36_s28, %s634_s14  ;;  %p640_p5 = scmp.lt.s32.totalorder %s634_s14, %s634_s14 }
   0xf   :  { %p641_p6 = por %p640_p5, %p639_p4 }
  0x11   :  { %p642_p7 = pnand %p641_p6, %p635_p3 }
  0x13   :  { %645 = shalt.err (!%p642_p7)
}
  0x14   :  { %s835_s15 = smov 64   ;;  %s836_s16 = smov 4  }
  0x15   :  { %41 = dma.hbm_to_vmem [thread:$0]  %s1004_s1, 256, %s36_s28, [#allocation6], %s835_s15, %s835_s15, %s836_s16  }
  0x16   :  { %s837_s19 = smov [#allocation8]   ;;  %s838_s21 = smov [#allocation11]  }
  0x17   :  { %s57_s20 = sshll.u32 %s837_s19, 4  ;;  %s79_s22 = sshll.u32 %s838_s21, 4  ;;  %s58_s20 = int_to_ptr.vmem [resolvable:$true] %s57_s20  ;;  %s80_s22 = int_to_ptr.vmem [resolvable:$true] %s79_s22 }
  0x18   :  { %s646_s25 = scalar_lea.hbm %s1006_s3, 1024 }
  0x19   :  { %p647_p8 = scmp.ne.s32.totalorder %s1006_s3, %s646_s25  ;;  %p650_p9 = scmp.lt.u32.totalorder %s646_s25, %s1006_s3 }
  0x1b   :  { %p652_p10 = pnand %p650_p9, %p647_p8 }
  0x1d   :  { %655 = shalt.err (!%p652_p10)
}
  0x1e   :  { %s656_s1 = scalar_lea.vmem %s58_s20, 1024  ;;  %p661_p12 = scmp.lt.s32.totalorder %s58_s20, %s58_s20 }
  0x1f   :  { %p657_p11 = scmp.ne.s32.totalorder %s58_s20, %s656_s1  ;;  %p662_p13 = scmp.lt.s32.totalorder %s656_s1, %s656_s1 }
  0x21   :  { %p663_p0 = por %p662_p13, %p661_p12 }
  0x23   :  { %p664_p1 = pnand %p663_p0, %p657_p11 }
  0x25   :  { %667 = shalt.err (!%p664_p1)
}
  0x26   :  { %63 = dma.hbm_to_vmem [thread:$0]  %s1006_s3, 1024, %s58_s20, [#allocation9], %s835_s15, %s835_s15, %s836_s16  }
  0x27   :  { %s668_s12 = scalar_lea.hbm %s1008_s5, 2048 }
  0x28   :  { %p669_p2 = scmp.ne.s32.totalorder %s1008_s5, %s668_s12  ;;  %p672_p3 = scmp.lt.u32.totalorder %s668_s12, %s1008_s5 }
  0x2a   :  { %p674_p4 = pnand %p672_p3, %p669_p2 }
  0x2c   :  { %677 = shalt.err (!%p674_p4)
}
  0x2d   :  { %s678_s19 = scalar_lea.vmem %s80_s22, 2048  ;;  %p683_p6 = scmp.lt.s32.totalorder %s80_s22, %s80_s22 }
  0x2e   :  { %p679_p5 = scmp.ne.s32.totalorder %s80_s22, %s678_s19  ;;  %p684_p7 = scmp.lt.s32.totalorder %s678_s19, %s678_s19 }
  0x30   :  { %p685_p8 = por %p684_p7, %p683_p6 }
  0x32   :  { %p686_p9 = pnand %p685_p8, %p679_p5 }
  0x34   :  { %689 = shalt.err (!%p686_p9)
}
  0x35   :  { %s839_s3 = smov 128   ;;  %s840_s15 = smov 8  }
  0x36   :  { %85 = dma.hbm_to_vmem [thread:$0]  %s1008_s5, 2048, %s80_s22, [#allocation12], %s839_s3, %s839_s3, %s840_s15  }
  0x37   :  { %s841_s21 = smov [#allocation2]   ;;  %s842_s24 = smov [#allocation7]  }
  0x38   :  { %s26_s23 = sshll.u32 %s841_s21, 4  ;;  %s48_s25 = sshll.u32 %s842_s24, 4  ;;  %s27_s23 = int_to_ptr.vmem [resolvable:$true] %s26_s23  ;;  %s49_s25 = int_to_ptr.vmem [resolvable:$true] %s48_s25 }
  0x39   :  { %s690_s29 = scalar_lea.hbm %s1003_s0, 128 }
  0x3a   :  { %p691_p10 = scmp.ne.s32.totalorder %s1003_s0, %s690_s29  ;;  %p694_p11 = scmp.lt.u32.totalorder %s690_s29, %s1003_s0 }
  0x3c   :  { %p696_p12 = pnand %p694_p11, %p691_p10 }
  0x3e   :  { %699 = shalt.err (!%p696_p12)
}
  0x3f   :  { %s700_s5 = scalar_lea.vmem %s27_s23, 128  ;;  %p705_p0 = scmp.lt.s32.totalorder %s27_s23, %s27_s23 }
  0x40   :  { %p701_p13 = scmp.ne.s32.totalorder %s27_s23, %s700_s5  ;;  %p706_p1 = scmp.lt.s32.totalorder %s700_s5, %s700_s5 }
  0x42   :  { %p707_p2 = por %p706_p1, %p705_p0 }
  0x44   :  { %p708_p3 = pnand %p707_p2, %p701_p13 }
  0x46   :  { %711 = shalt.err (!%p708_p3)
}
  0x47   :  { %29 = dma.hbm_to_vmem [thread:$0]  %s1003_s0, 128, %s27_s23, [#allocation3]  }
  0x48   :  { %s712_s13 = scalar_lea.hbm %s1005_s2, 16 }
  0x49   :  { %p713_p4 = scmp.ne.s32.totalorder %s1005_s2, %s712_s13  ;;  %p716_p5 = scmp.lt.u32.totalorder %s712_s13, %s1005_s2 }
  0x4b   :  { %p718_p6 = pnand %p716_p5, %p713_p4 }
  0x4d   :  { %721 = shalt.err (!%p718_p6)
}
  0x4e   :  { %s722_s3 = scalar_lea.vmem %s49_s25, 16  ;;  %s726_s15 = scalar_lea.vmem %s49_s25, 32 }
  0x4f   :  { %p723_p7 = scmp.ne.s32.totalorder %s49_s25, %s722_s3  ;;  %p727_p8 = scmp.lt.s32.totalorder %s49_s25, %s49_s25 }
  0x50   :  { %p728_p9 = scmp.lt.s32.totalorder %s726_s15, %s722_s3 }
  0x52   :  { %p729_p10 = por %p728_p9, %p727_p8 }
  0x54   :  { %p730_p11 = pnand %p729_p10, %p723_p7 }
  0x56   :  { %733 = shalt.err (!%p730_p11)
}
  0x57   :  { %51 = dma.hbm_to_vmem [thread:$0]  %s1005_s2, 16, %s49_s25, [#allocation6]  }
  0x58   :  { %s843_s20 = smov [#allocation10]   ;;  %s844_s23 = smov [#allocation13]  }
  0x59   :  { %s70_s21 = sshll.u32 %s843_s20, 4  ;;  %s92_s24 = sshll.u32 %s844_s23, 4  ;;  %s71_s21 = int_to_ptr.vmem [resolvable:$true] %s70_s21  ;;  %s93_s24 = int_to_ptr.vmem [resolvable:$true] %s92_s24 }
  0x5a   :  { %s734_s29 = scalar_lea.hbm %s1007_s4, 16 }
  0x5b   :  { %p735_p12 = scmp.ne.s32.totalorder %s1007_s4, %s734_s29  ;;  %p738_p13 = scmp.lt.u32.totalorder %s734_s29, %s1007_s4 }
  0x5d   :  { %p740_p0 = pnand %p738_p13, %p735_p12 }
  0x5f   :  { %743 = shalt.err (!%p740_p0)
}
  0x60   :  { %s744_s2 = scalar_lea.vmem %s71_s21, 16  ;;  %s748_s25 = scalar_lea.vmem %s71_s21, 32 }
  0x61   :  { %p745_p1 = scmp.ne.s32.totalorder %s71_s21, %s744_s2  ;;  %p749_p2 = scmp.lt.s32.totalorder %s71_s21, %s71_s21 }
  0x62   :  { %p750_p3 = scmp.lt.s32.totalorder %s748_s25, %s744_s2 }
  0x64   :  { %p751_p4 = por %p750_p3, %p749_p2 }
  0x66   :  { %p752_p5 = pnand %p751_p4, %p745_p1 }
  0x68   :  { %755 = shalt.err (!%p752_p5)
}
  0x69   :  { %73 = dma.hbm_to_vmem [thread:$0]  %s1007_s4, 16, %s71_s21, [#allocation9]  }
  0x6a   :  { %s756_s12 = scalar_lea.hbm %s1009_s6, 32 }
  0x6b   :  { %p757_p6 = scmp.ne.s32.totalorder %s1009_s6, %s756_s12  ;;  %p760_p7 = scmp.lt.u32.totalorder %s756_s12, %s1009_s6 }
  0x6d   :  { %p762_p8 = pnand %p760_p7, %p757_p6 }
  0x6f   :  { %765 = shalt.err (!%p762_p8)
}
  0x70   :  { %s766_s19 = scalar_lea.vmem %s93_s24, 32  ;;  %p771_p10 = scmp.lt.s32.totalorder %s93_s24, %s93_s24 }
  0x71   :  { %p767_p9 = scmp.ne.s32.totalorder %s93_s24, %s766_s19  ;;  %p772_p11 = scmp.lt.s32.totalorder %s766_s19, %s766_s19 }
  0x73   :  { %p773_p12 = por %p772_p11, %p771_p10 }
  0x75   :  { %p774_p13 = pnand %p773_p12, %p767_p9 }
  0x77   :  { %777 = shalt.err (!%p774_p13)
}
  0x78   :  { %95 = dma.hbm_to_vmem [thread:$0]  %s1009_s6, 32, %s93_s24, [#allocation12]  }
  0x79   :  { %822 = dma.done.wait [#allocation3], 128  }
  0x7a   :  { %823 = vsyncadd [#allocation3], 4294967168 }
  0x7b   :  { %824 = dma.done.wait [#allocation6], 272  }
  0x7c   :  { %825 = vsyncadd [#allocation6], 4294967024 }
  0x7d   :  { %826 = dma.done.wait [#allocation9], 1040  }
  0x7e   :  { %827 = vsyncadd [#allocation9], 4294966256 }
  0x7f   :  { %828 = dma.done.wait [#allocation12], 2080  }
  0x80   :  { %829 = vsyncadd [#allocation12], 4294965216  ;;  %v845_v0 = vmov 0.0   ;;  %vm846_vm0 = vmmov 0   ;;  %v586_v1 = vld [vmem:[#allocation5] sm:$0xff]   ;;  %v587_v2 = vld [vmem:[#allocation5 + $0x8] sm:$0xff]   ;;  %v320_v46 = vlaneseq }
  0x81   :  { %542 = vmatprep.subr.bf16.mxu0 %v845_v0  ;;  %546 = vmatprep.mubr.msk.bf16.mxu0 %vm846_vm0, %v845_v0  ;;  %v118_v3 = vld [vmem:[#allocation2] sm:$0xff]  ;;  %vm143_vm1 = vcmask 261120   ;;  %v590_v7 = vld [vmem:[#allocation8 + $0x10] sm:$0xff]   ;;  %v591_v8 = vld [vmem:[#allocation8 + $0x18] sm:$0xff]   ;;  %v847_v37 = vmov 0   ;;  %s848_s6 = smov [#allocation14]  }
  0x82   :  { %550 = vmatprep.subr.bf16.mxu1 %v845_v0  ;;  %566 = vmatprep.mubr.msk.bf16.mxu1 %vm846_vm0, %v845_v0  ;;  %v588_v4 = vld [vmem:[#allocation8] sm:$0xff]   ;;  %v119_v5 = vpack.c.bf16 %v118_v3, %v118_v3  ;;  %v589_v6 = vld [vmem:[#allocation8 + $0x8] sm:$0xff]   ;;  %v594_v11 = vld [vmem:[#allocation8 + $0x30] sm:$0xff]   ;;  %v321_v47 = vshrl.u32 %v320_v46, 7  ;;  %s475_s15 = sshll.u32 %s848_s6, 4  ;;  %s476_s15 = int_to_ptr.vmem [resolvable:$true] %s475_s15 }
  0x83   :  { %543 = vmatpush3.bf16.msra.mxu0 %v586_v1  ;;  %551 = vmatpush3.bf16.msra.mxu1 %v588_v4  ;;  %v592_v9 = vld [vmem:[#allocation8 + $0x20] sm:$0xff]   ;;  %v593_v10 = vld [vmem:[#allocation8 + $0x28] sm:$0xff]   ;;  %v595_v12 = vld [vmem:[#allocation8 + $0x38] sm:$0xff]   ;;  %s778_s0 = scalar_lea.vmem %s476_s15, 128  ;;  %p783_p1 = scmp.lt.s32.totalorder %s476_s15, %s476_s15 }
  0x84   :  { %544 = vmatprep.subr.bf16.mxu0 %v845_v0  ;;  %552 = vmatprep.subr.bf16.mxu1 %v845_v0  ;;  %v596_v13 = vld [vmem:[#allocation11] ss:$8 sps:$4 sm:$0xff]   ;;  %v598_v14 = vld [vmem:[#allocation11 + $0x4] ss:$8 sps:$4 sm:$0xff]   ;;  %v601_v15 = vld [vmem:[#allocation11 + $0x14] ss:$8 sps:$4 sm:$0xff]   ;;  %p779_p0 = scmp.ne.s32.totalorder %s476_s15, %s778_s0  ;;  %p784_p2 = scmp.lt.s32.totalorder %s778_s0, %s778_s0 }
  0x85   :  { %v599_v16 = vld [vmem:[#allocation11 + $0x10] ss:$8 sps:$4 sm:$0xff]   ;;  %v604_v17 = vld [vmem:[#allocation11 + $0x24] ss:$8 sps:$4 sm:$0xff]   ;;  %v602_v18 = vld [vmem:[#allocation11 + $0x20] ss:$8 sps:$4 sm:$0xff]  }
  0x86   :  { %v607_v19 = vld [vmem:[#allocation11 + $0x34] ss:$8 sps:$4 sm:$0xff]   ;;  %v605_v20 = vld [vmem:[#allocation11 + $0x30] ss:$8 sps:$4 sm:$0xff]   ;;  %v610_v21 = vld [vmem:[#allocation11 + $0x44] ss:$8 sps:$4 sm:$0xff]   ;;  %p785_p3 = por %p784_p2, %p783_p1 }
  0x87   :  { %545 = vmatpush3.bf16.msra.mxu0 %v587_v2  ;;  %553 = vmatpush3.bf16.msra.mxu1 %v589_v6  ;;  %v608_v22 = vld [vmem:[#allocation11 + $0x40] ss:$8 sps:$4 sm:$0xff]   ;;  %v613_v23 = vld [vmem:[#allocation11 + $0x54] ss:$8 sps:$4 sm:$0xff]   ;;  %v611_v24 = vld [vmem:[#allocation11 + $0x50] ss:$8 sps:$4 sm:$0xff]  }
  0x88   :  { %554 = vmatprep.subr.bf16.mxu1 %v845_v0  ;;  %410 = vmatprep.subr.bf16.mxu0 %v598_v14  ;;  %v616_v25 = vld [vmem:[#allocation11 + $0x64] ss:$8 sps:$4 sm:$0xff]   ;;  %v614_v26 = vld [vmem:[#allocation11 + $0x60] ss:$8 sps:$4 sm:$0xff]   ;;  %v501_v27 = vld [vmem:[#allocation7] ss:$0 sm:$0xff]  ;;  %p786_p4 = pnand %p785_p3, %p779_p0 }
  0x89   :  { %v619_v35 = vld [vmem:[#allocation11 + $0x74] ss:$8 sps:$4 sm:$0xff]   ;;  %v617_v36 = vld [vmem:[#allocation11 + $0x70] ss:$8 sps:$4 sm:$0xff]   ;;  %v322_v48 = vsub.s32 0, %v321_v47  ;;  %v326_v50 = vsub.s32 1, %v321_v47 }
  0x8a   :  { %547 = vmatmul.mubr.msk.bf16.vlgmr.msra.gmra.mrb[0].mxu0 %vm143_vm1, %v119_v5  ;;  %v505_v38 = vld [vmem:[#allocation10] ss:$0 sm:$0xff]  ;;  %v318_v49 = vld [vmem:[#allocation13] sm:$0x3] }
  0x8b   :  { %555 = vmatpush3.bf16.msra.mxu1 %v590_v7  ;;  %411 = vmatpush1.bf16.msra.mxu0 %v596_v13  ;;  %v323_v51 = vrot.slane %v318_v49, %v322_v48  ;;  %v327_v52 = vrot.slane %v318_v49, %v326_v50 }
  0x8c   :  { %556 = vmatprep.subr.bf16.mxu1 %v845_v0  ;;  %412 = vmatprep.subr.bf16.mxu0 %v601_v15 }
  0x8d   :  { %442 = vmatprep.mubr.bf16.mxu0 %v847_v37 }
  0x8f   :  { %557 = vmatpush3.bf16.msra.mxu1 %v591_v8  ;;  %413 = vmatpush1.bf16.msra.mxu0 %v599_v16 }
  0x90   :  { %558 = vmatprep.subr.bf16.mxu1 %v845_v0  ;;  %414 = vmatprep.subr.bf16.mxu0 %v604_v17 }
  0x93   :  { %559 = vmatpush3.bf16.msra.mxu1 %v592_v9  ;;  %415 = vmatpush1.bf16.msra.mxu0 %v602_v18 }
  0x94   :  { %560 = vmatprep.subr.bf16.mxu1 %v845_v0  ;;  %416 = vmatprep.subr.bf16.mxu0 %v607_v19 }
  0x97   :  { %561 = vmatpush3.bf16.msra.mxu1 %v593_v10  ;;  %417 = vmatpush1.bf16.msra.mxu0 %v605_v20 }
  0x98   :  { %562 = vmatprep.subr.bf16.mxu1 %v845_v0  ;;  %418 = vmatprep.subr.bf16.mxu0 %v610_v21 }
  0x9b   :  { %563 = vmatpush3.bf16.msra.mxu1 %v594_v11  ;;  %419 = vmatpush1.bf16.msra.mxu0 %v608_v22 }
  0x9c   :  { %564 = vmatprep.subr.bf16.mxu1 %v845_v0  ;;  %420 = vmatprep.subr.bf16.mxu0 %v613_v23 }
  0x9f   :  { %565 = vmatpush3.bf16.msra.mxu1 %v595_v12  ;;  %421 = vmatpush1.bf16.msra.mxu0 %v611_v24 }
  0xa0   :  { %422 = vmatprep.subr.bf16.mxu0 %v616_v25 }
  0xa3   :  { %423 = vmatpush1.bf16.msra.mxu0 %v614_v26 }
  0xa4   :  { %424 = vmatprep.subr.bf16.mxu0 %v619_v35 }
  0xa7   :  { %425 = vmatpush1.bf16.msra.mxu0 %v617_v36 }
 0x15d   :  { %v181_v28 = vpop.f32.mrb[0].mxu0 }
 0x15e   :  { %v182_v29 = vadd.f32 %v501_v27, %v181_v28  ;;  %v548_v30 = vpop.f32.mrb[1].mxu0 }
 0x15f   :  { %v184_v31 = vpop.f32.mrb[2].mxu0 }
 0x160   :  { %v187_v32 = vmax.f32 %v182_v29, 0.0  ;;  %v549_v33 = vpop.f32.mrb[3].mxu0 }
 0x162   :  { %v188_v34 = vpack.c.bf16 %v187_v32, %v187_v32 }
 0x164   :  { %567 = vmatmul.mubr.bf16.vlgmr.msra.gmra.mrb[0].mxu1 %v188_v34 }
 0x237   :  { %v294_v39 = vpop.f32.mrb[0].mxu1 }
 0x238   :  { %v295_v40 = vadd.f32 %v505_v38, %v294_v39  ;;  %v568_v41 = vpop.f32.mrb[1].mxu1 }
 0x239   :  { %v297_v42 = vpop.f32.mrb[2].mxu1 }
 0x23a   :  { %v300_v43 = vmax.f32 %v295_v40, 0.0  ;;  %v569_v44 = vpop.f32.mrb[3].mxu1 }
 0x23c   :  { %v301_v45 = vpack.c.bf16 %v300_v43, %v300_v43 }
 0x23e   :  { %443 = vmatmul.mubr.bf16.vlgmr.msra.gmra.mrb[4].mxu0 %v301_v45 }
 0x311   :  { %v444_v53 = vpop.f32.mrb[4].mxu0 }
 0x312   :  { %v445_v54 = vadd.f32 %v444_v53, %v323_v51  ;;  %v446_v55 = vpop.f32.mrb[5].mxu0 }
 0x313   :  { %v447_v56 = vadd.f32 %v446_v55, %v327_v52  ;;  %v448_v57 = vpop.f32.mrb[6].mxu0 }
 0x314   :  { %467 = vst [vmem:[#allocation14] sm:$0xff] %v445_v54  ;;  %v449_v58 = vpop.f32.mrb[7].mxu0 }
 0x315   :  { %v452_v59 = vand.u32 2147483647, %v447_v56 }
 0x316   :  { %789 = shalt.err (!%p786_p4)
}
 0x317   :  { %s790_s21 = scalar_lea.hbm %s1010_s7, 128 }
 0x318   :  { %p791_p5 = scmp.ne.s32.totalorder %s1010_s7, %s790_s21  ;;  %p794_p6 = scmp.lt.u32.totalorder %s790_s21, %s1010_s7 }
 0x31a   :  { %p796_p7 = pnand %p794_p6, %p791_p5 }
 0x31c   :  { %799 = shalt.err (!%p796_p7)
}
 0x31d   :  { %478 = dma.vmem_to_hbm [thread:$0]  %s476_s15, 128, %s1010_s7, [#allocation4]   ;;  %v453_v60 = vsub.f32 0.0, %v452_v59  ;;  %v451_v6 = vmax.f32 %v447_v56, 0.0 }
 0x31e   :  { %s849_s1 = smov [#allocation15]  }
 0x31f   :  { %v454_v61 = vmul.f32 1.442695, %v453_v60  ;;  %s485_s28 = sshll.u32 %s849_s1, 4  ;;  %s486_s28 = int_to_ptr.vmem [resolvable:$true] %s485_s28 }
 0x320   :  { %s800_s7 = scalar_lea.vmem %s486_s28, 128  ;;  %p805_p9 = scmp.lt.s32.totalorder %s486_s28, %s486_s28 }
 0x321   :  { %620 = vpow2.f32 %v454_v61  ;;  %p801_p8 = scmp.ne.s32.totalorder %s486_s28, %s800_s7  ;;  %p806_p10 = scmp.lt.s32.totalorder %s800_s7, %s800_s7 }
 0x323   :  { %p807_p11 = por %p806_p10, %p805_p9 }
 0x325   :  { %p808_p12 = pnand %p807_p11, %p801_p8 }
 0x32b   :  { %v621_v62 = vpop.eup %620 }
 0x32c   :  { %v456_v63 = vadd.f32 1.0, %v621_v62  ;;  %v459_v0 = vmul.f32 -0.5, %v621_v62  ;;  %v462_v2 = vand.u32 2147483647, %v621_v62 }
 0x32e   :  { %622 = vlog2.f32 %v456_v63  ;;  %v460_v1 = vadd.f32 1.0, %v459_v0  ;;  %vm463_vm2 = vcmp.lt.f32.partialorder %v462_v2, 0.0004427343 }
 0x330   :  { %v461_v5 = vmul.f32 %v621_v62, %v460_v1 }
 0x338   :  { %v623_v3 = vpop.eup %622 }
 0x339   :  { %v458_v4 = vmul.f32 0.6931472, %v623_v3 }
 0x33b   :  { %v464_v7 = vsel %vm463_vm2, %v461_v5, %v458_v4 }
 0x33c   :  { %v465_v8 = vadd.f32 %v464_v7, %v451_v6 }
 0x33e   :  { %v466_v9 = vadd.f32 1e-07, %v465_v8 }
 0x340   :  { %468 = vst [vmem:[#allocation15] sm:$0xff] %v466_v9 }
 0x341   :  { %811 = shalt.err (!%p808_p12)
}
 0x342   :  { %s812_s25 = scalar_lea.hbm %s1011_s8, 128 }
 0x343   :  { %p813_p13 = scmp.ne.s32.totalorder %s1011_s8, %s812_s25  ;;  %p816_p0 = scmp.lt.u32.totalorder %s812_s25, %s1011_s8 }
 0x345   :  { %p818_p1 = pnand %p816_p0, %p813_p13 }
 0x347   :  { %821 = shalt.err (!%p818_p1)
}
 0x348   :  { %488 = dma.vmem_to_hbm [thread:$0]  %s486_s28, 128, %s1011_s8, [#allocation16]  }
 0x349   :  { %830 = dma.done.wait [#allocation4], 128  }
 0x34a   :  { %831 = vsyncadd [#allocation4], 4294967168 }
 0x34b   :  { %832 = dma.done.wait [#allocation16], 128  }
 0x34c   :  { %833 = vsyncadd [#allocation16], 4294967168 }
 0x34d   :  { %495 = vsyncpa [#allocation3], 1 }
 0x34e   :  { %496 = vsyncpa [#allocation6], 1 }
 0x34f   :  { %497 = vsyncpa [#allocation9], 1 }
 0x350   :  { %498 = vsyncpa [#allocation12], 1 }
 0x351   :  { %499 = vsyncpa [#allocation4], 1 }
 0x352   :  { %500 = vsyncpa [#allocation16], 1 }

// kernel: tpu_custom_call.1
= control target key start
LH: loop header
LB: loop body
LE: loop exit
PB: predicated region body
PF: predicated region fallthrough
CT: control target
= control target key end

     0   :  { %14 = vsyncpa [#allocation3], 0  ;;  %s1003_s0 = inlined_call_operand.hbm [shape: f32[8,32], index: 0, kind: input, shape index: {}]   ;;  %s1004_s1 = inlined_call_operand.hbm [shape: bf16[32,128], index: 1, kind: input, shape index: {}]   ;;  %s1005_s2 = inlined_call_operand.hbm [shape: f32[1,128], index: 2, kind: input, shape index: {}]   ;;  %s1006_s3 = inlined_call_operand.hbm [shape: bf16[128,128], index: 3, kind: input, shape index: {}]   ;;  %s1007_s4 = inlined_call_operand.hbm [shape: f32[1,128], index: 4, kind: input, shape index: {}]   ;;  %s1008_s5 = inlined_call_operand.hbm [shape: bf16[128,256], index: 5, kind: input, shape index: {}]   ;;  %s1009_s6 = inlined_call_operand.hbm [shape: f32[1,256], index: 6, kind: input, shape index: {}]   ;;  %s1010_s7 = inlined_call_operand.hbm [shape: f32[8,128], index: 7, kind: output, shape index: {0}]   ;;  %s1011_s8 = inlined_call_operand.hbm [shape: f32[8,128], index: 8, kind: output, shape index: {1}]  }
   0x1   :  { %15 = vsyncpa [#allocation6], 0 }
   0x2   :  { %16 = vsyncpa [#allocation9], 0 }
   0x3   :  { %17 = vsyncpa [#allocation12], 0 }
   0x4   :  { %18 = vsyncpa [#allocation4], 0 }
   0x5   :  { %19 = vsyncpa [#allocation16], 0  ;;  %s834_s27 = smov [#allocation5]   ;;  %s624_s9 = scalar_lea.hbm %s1004_s1, 256 }
   0x6   :  { %s35_s28 = sshll.u32 %s834_s27, 4  ;;  %p625_p0 = scmp.ne.s32.totalorder %s1004_s1, %s624_s9  ;;  %s36_s28 = int_to_ptr.vmem [resolvable:$true] %s35_s28 }
   0x7   :  { %p628_p1 = scmp.lt.u32.totalorder %s624_s9, %s1004_s1 }
   0x9   :  { %p630_p2 = pnand %p628_p1, %p625_p0 }
   0xb   :  { %633 = shalt.err (!%p630_p2)
}
   0xc   :  { %s634_s14 = scalar_lea.vmem %s36_s28, 256  ;;  %p639_p4 = scmp.lt.s32.totalorder %s36_s28, %s36_s28 }
   0xd   :  { %p635_p3 = scmp.ne.s32.totalorder %s36_s28, %s634_s14  ;;  %p640_p5 = scmp.lt.s32.totalorder %s634_s14, %s634_s14 }
   0xf   :  { %p641_p6 = por %p640_p5, %p639_p4 }
  0x11   :  { %p642_p7 = pnand %p641_p6, %p635_p3 }
  0x13   :  { %645 = shalt.err (!%p642_p7)
}
  0x14   :  { %s835_s15 = smov 64   ;;  %s836_s16 = smov 4  }
  0x15   :  { %41 = dma.hbm_to_vmem [thread:$0]  %s1004_s1, 256, %s36_s28, [#allocation6], %s835_s15, %s835_s15, %s836_s16  }
  0x16   :  { %s837_s19 = smov [#allocation8]   ;;  %s838_s21 = smov [#allocation11]  }
  0x17   :  { %s57_s20 = sshll.u32 %s837_s19, 4  ;;  %s79_s22 = sshll.u32 %s838_s21, 4  ;;  %s58_s20 = int_to_ptr.vmem [resolvable:$true] %s57_s20  ;;  %s80_s22 = int_to_ptr.vmem [resolvable:$true] %s79_s22 }
  0x18   :  { %s646_s25 = scalar_lea.hbm %s1006_s3, 1024 }
  0x19   :  { %p647_p8 = scmp.ne.s32.totalorder %s1006_s3, %s646_s25  ;;  %p650_p9 = scmp.lt.u32.totalorder %s646_s25, %s1006_s3 }
  0x1b   :  { %p652_p10 = pnand %p650_p9, %p647_p8 }
  0x1d   :  { %655 = shalt.err (!%p652_p10)
}
  0x1e   :  { %s656_s1 = scalar_lea.vmem %s58_s20, 1024  ;;  %p661_p12 = scmp.lt.s32.totalorder %s58_s20, %s58_s20 }
  0x1f   :  { %p657_p11 = scmp.ne.s32.totalorder %s58_s20, %s656_s1  ;;  %p662_p13 = scmp.lt.s32.totalorder %s656_s1, %s656_s1 }
  0x21   :  { %p663_p0 = por %p662_p13, %p661_p12 }
  0x23   :  { %p664_p1 = pnand %p663_p0, %p657_p11 }
  0x25   :  { %667 = shalt.err (!%p664_p1)
}
  0x26   :  { %63 = dma.hbm_to_vmem [thread:$0]  %s1006_s3, 1024, %s58_s20, [#allocation9], %s835_s15, %s835_s15, %s836_s16  }
  0x27   :  { %s668_s12 = scalar_lea.hbm %s1008_s5, 2048 }
  0x28   :  { %p669_p2 = scmp.ne.s32.totalorder %s1008_s5, %s668_s12  ;;  %p672_p3 = scmp.lt.u32.totalorder %s668_s12, %s1008_s5 }
  0x2a   :  { %p674_p4 = pnand %p672_p3, %p669_p2 }
  0x2c   :  { %677 = shalt.err (!%p674_p4)
}
  0x2d   :  { %s678_s19 = scalar_lea.vmem %s80_s22, 2048  ;;  %p683_p6 = scmp.lt.s32.totalorder %s80_s22, %s80_s22 }
  0x2e   :  { %p679_p5 = scmp.ne.s32.totalorder %s80_s22, %s678_s19  ;;  %p684_p7 = scmp.lt.s32.totalorder %s678_s19, %s678_s19 }
  0x30   :  { %p685_p8 = por %p684_p7, %p683_p6 }
  0x32   :  { %p686_p9 = pnand %p685_p8, %p679_p5 }
  0x34   :  { %689 = shalt.err (!%p686_p9)
}
  0x35   :  { %s839_s3 = smov 128   ;;  %s840_s15 = smov 8  }
  0x36   :  { %85 = dma.hbm_to_vmem [thread:$0]  %s1008_s5, 2048, %s80_s22, [#allocation12], %s839_s3, %s839_s3, %s840_s15  }
  0x37   :  { %s841_s21 = smov [#allocation2]   ;;  %s842_s24 = smov [#allocation7]  }
  0x38   :  { %s26_s23 = sshll.u32 %s841_s21, 4  ;;  %s48_s25 = sshll.u32 %s842_s24, 4  ;;  %s27_s23 = int_to_ptr.vmem [resolvable:$true] %s26_s23  ;;  %s49_s25 = int_to_ptr.vmem [resolvable:$true] %s48_s25 }
  0x39   :  { %s690_s29 = scalar_lea.hbm %s1003_s0, 128 }
  0x3a   :  { %p691_p10 = scmp.ne.s32.totalorder %s1003_s0, %s690_s29  ;;  %p694_p11 = scmp.lt.u32.totalorder %s690_s29, %s1003_s0 }
  0x3c   :  { %p696_p12 = pnand %p694_p11, %p691_p10 }
  0x3e   :  { %699 = shalt.err (!%p696_p12)
}
  0x3f   :  { %s700_s5 = scalar_lea.vmem %s27_s23, 128  ;;  %p705_p0 = scmp.lt.s32.totalorder %s27_s23, %s27_s23 }
  0x40   :  { %p701_p13 = scmp.ne.s32.totalorder %s27_s23, %s700_s5  ;;  %p706_p1 = scmp.lt.s32.totalorder %s700_s5, %s700_s5 }
  0x42   :  { %p707_p2 = por %p706_p1, %p705_p0 }
  0x44   :  { %p708_p3 = pnand %p707_p2, %p701_p13 }
  0x46   :  { %711 = shalt.err (!%p708_p3)
}
  0x47   :  { %29 = dma.hbm_to_vmem [thread:$0]  %s1003_s0, 128, %s27_s23, [#allocation3]  }
  0x48   :  { %s712_s13 = scalar_lea.hbm %s1005_s2, 16 }
  0x49   :  { %p713_p4 = scmp.ne.s32.totalorder %s1005_s2, %s712_s13  ;;  %p716_p5 = scmp.lt.u32.totalorder %s712_s13, %s1005_s2 }
  0x4b   :  { %p718_p6 = pnand %p716_p5, %p713_p4 }
  0x4d   :  { %721 = shalt.err (!%p718_p6)
}
  0x4e   :  { %s722_s3 = scalar_lea.vmem %s49_s25, 16  ;;  %s726_s15 = scalar_lea.vmem %s49_s25, 32 }
  0x4f   :  { %p723_p7 = scmp.ne.s32.totalorder %s49_s25, %s722_s3  ;;  %p727_p8 = scmp.lt.s32.totalorder %s49_s25, %s49_s25 }
  0x50   :  { %p728_p9 = scmp.lt.s32.totalorder %s726_s15, %s722_s3 }
  0x52   :  { %p729_p10 = por %p728_p9, %p727_p8 }
  0x54   :  { %p730_p11 = pnand %p729_p10, %p723_p7 }
  0x56   :  { %733 = shalt.err (!%p730_p11)
}
  0x57   :  { %51 = dma.hbm_to_vmem [thread:$0]  %s1005_s2, 16, %s49_s25, [#allocation6]  }
  0x58   :  { %s843_s20 = smov [#allocation10]   ;;  %s844_s23 = smov [#allocation13]  }
  0x59   :  { %s70_s21 = sshll.u32 %s843_s20, 4  ;;  %s92_s24 = sshll.u32 %s844_s23, 4  ;;  %s71_s21 = int_to_ptr.vmem [resolvable:$true] %s70_s21  ;;  %s93_s24 = int_to_ptr.vmem [resolvable:$true] %s92_s24 }
  0x5a   :  { %s734_s29 = scalar_lea.hbm %s1007_s4, 16 }
  0x5b   :  { %p735_p12 = scmp.ne.s32.totalorder %s1007_s4, %s734_s29  ;;  %p738_p13 = scmp.lt.u32.totalorder %s734_s29, %s1007_s4 }
  0x5d   :  { %p740_p0 = pnand %p738_p13, %p735_p12 }
  0x5f   :  { %743 = shalt.err (!%p740_p0)
}
  0x60   :  { %s744_s2 = scalar_lea.vmem %s71_s21, 16  ;;  %s748_s25 = scalar_lea.vmem %s71_s21, 32 }
  0x61   :  { %p745_p1 = scmp.ne.s32.totalorder %s71_s21, %s744_s2  ;;  %p749_p2 = scmp.lt.s32.totalorder %s71_s21, %s71_s21 }
  0x62   :  { %p750_p3 = scmp.lt.s32.totalorder %s748_s25, %s744_s2 }
  0x64   :  { %p751_p4 = por %p750_p3, %p749_p2 }
  0x66   :  { %p752_p5 = pnand %p751_p4, %p745_p1 }
  0x68   :  { %755 = shalt.err (!%p752_p5)
}
  0x69   :  { %73 = dma.hbm_to_vmem [thread:$0]  %s1007_s4, 16, %s71_s21, [#allocation9]  }
  0x6a   :  { %s756_s12 = scalar_lea.hbm %s1009_s6, 32 }
  0x6b   :  { %p757_p6 = scmp.ne.s32.totalorder %s1009_s6, %s756_s12  ;;  %p760_p7 = scmp.lt.u32.totalorder %s756_s12, %s1009_s6 }
  0x6d   :  { %p762_p8 = pnand %p760_p7, %p757_p6 }
  0x6f   :  { %765 = shalt.err (!%p762_p8)
}
  0x70   :  { %s766_s19 = scalar_lea.vmem %s93_s24, 32  ;;  %p771_p10 = scmp.lt.s32.totalorder %s93_s24, %s93_s24 }
  0x71   :  { %p767_p9 = scmp.ne.s32.totalorder %s93_s24, %s766_s19  ;;  %p772_p11 = scmp.lt.s32.totalorder %s766_s19, %s766_s19 }
  0x73   :  { %p773_p12 = por %p772_p11, %p771_p10 }
  0x75   :  { %p774_p13 = pnand %p773_p12, %p767_p9 }
  0x77   :  { %777 = shalt.err (!%p774_p13)
}
  0x78   :  { %95 = dma.hbm_to_vmem [thread:$0]  %s1009_s6, 32, %s93_s24, [#allocation12]  }
  0x79   :  { %822 = dma.done.wait [#allocation3], 128  }
  0x7a   :  { %823 = vsyncadd [#allocation3], 4294967168 }
  0x7b   :  { %824 = dma.done.wait [#allocation6], 272  }
  0x7c   :  { %825 = vsyncadd [#allocation6], 4294967024 }
  0x7d   :  { %826 = dma.done.wait [#allocation9], 1040  }
  0x7e   :  { %827 = vsyncadd [#allocation9], 4294966256 }
  0x7f   :  { %828 = dma.done.wait [#allocation12], 2080  }
  0x80   :  { %829 = vsyncadd [#allocation12], 4294965216  ;;  %v845_v0 = vmov 0.0   ;;  %vm846_vm0 = vmmov 0   ;;  %v586_v1 = vld [vmem:[#allocation5] sm:$0xff]   ;;  %v587_v2 = vld [vmem:[#allocation5 + $0x8] sm:$0xff]   ;;  %v320_v46 = vlaneseq }
  0x81   :  { %542 = vmatprep.subr.bf16.mxu0 %v845_v0  ;;  %546 = vmatprep.mubr.msk.bf16.mxu0 %vm846_vm0, %v845_v0  ;;  %v118_v3 = vld [vmem:[#allocation2] sm:$0xff]  ;;  %vm143_vm1 = vcmask 261120   ;;  %v590_v7 = vld [vmem:[#allocation8 + $0x10] sm:$0xff]   ;;  %v591_v8 = vld [vmem:[#allocation8 + $0x18] sm:$0xff]   ;;  %v847_v37 = vmov 0   ;;  %s848_s6 = smov [#allocation14]  }
  0x82   :  { %550 = vmatprep.subr.bf16.mxu1 %v845_v0  ;;  %566 = vmatprep.mubr.msk.bf16.mxu1 %vm846_vm0, %v845_v0  ;;  %v588_v4 = vld [vmem:[#allocation8] sm:$0xff]   ;;  %v119_v5 = vpack.c.bf16 %v118_v3, %v118_v3  ;;  %v589_v6 = vld [vmem:[#allocation8 + $0x8] sm:$0xff]   ;;  %v594_v11 = vld [vmem:[#allocation8 + $0x30] sm:$0xff]   ;;  %v321_v47 = vshrl.u32 %v320_v46, 7  ;;  %s475_s15 = sshll.u32 %s848_s6, 4  ;;  %s476_s15 = int_to_ptr.vmem [resolvable:$true] %s475_s15 }
  0x83   :  { %543 = vmatpush3.bf16.msra.mxu0 %v586_v1  ;;  %551 = vmatpush3.bf16.msra.mxu1 %v588_v4  ;;  %v592_v9 = vld [vmem:[#allocation8 + $0x20] sm:$0xff]   ;;  %v593_v10 = vld [vmem:[#allocation8 + $0x28] sm:$0xff]   ;;  %v595_v12 = vld [vmem:[#allocation8 + $0x38] sm:$0xff]   ;;  %s778_s0 = scalar_lea.vmem %s476_s15, 128  ;;  %p783_p1 = scmp.lt.s32.totalorder %s476_s15, %s476_s15 }
  0x84   :  { %544 = vmatprep.subr.bf16.mxu0 %v845_v0  ;;  %552 = vmatprep.subr.bf16.mxu1 %v845_v0  ;;  %v596_v13 = vld [vmem:[#allocation11] ss:$8 sps:$4 sm:$0xff]   ;;  %v598_v14 = vld [vmem:[#allocation11 + $0x4] ss:$8 sps:$4 sm:$0xff]   ;;  %v601_v15 = vld [vmem:[#allocation11 + $0x14] ss:$8 sps:$4 sm:$0xff]   ;;  %p779_p0 = scmp.ne.s32.totalorder %s476_s15, %s778_s0  ;;  %p784_p2 = scmp.lt.s32.totalorder %s778_s0, %s778_s0 }
  0x85   :  { %v599_v16 = vld [vmem:[#allocation11 + $0x10] ss:$8 sps:$4 sm:$0xff]   ;;  %v604_v17 = vld [vmem:[#allocation11 + $0x24] ss:$8 sps:$4 sm:$0xff]   ;;  %v602_v18 = vld [vmem:[#allocation11 + $0x20] ss:$8 sps:$4 sm:$0xff]  }
  0x86   :  { %v607_v19 = vld [vmem:[#allocation11 + $0x34] ss:$8 sps:$4 sm:$0xff]   ;;  %v605_v20 = vld [vmem:[#allocation11 + $0x30] ss:$8 sps:$4 sm:$0xff]   ;;  %v610_v21 = vld [vmem:[#allocation11 + $0x44] ss:$8 sps:$4 sm:$0xff]   ;;  %p785_p3 = por %p784_p2, %p783_p1 }
  0x87   :  { %545 = vmatpush3.bf16.msra.mxu0 %v587_v2  ;;  %553 = vmatpush3.bf16.msra.mxu1 %v589_v6  ;;  %v608_v22 = vld [vmem:[#allocation11 + $0x40] ss:$8 sps:$4 sm:$0xff]   ;;  %v613_v23 = vld [vmem:[#allocation11 + $0x54] ss:$8 sps:$4 sm:$0xff]   ;;  %v611_v24 = vld [vmem:[#allocation11 + $0x50] ss:$8 sps:$4 sm:$0xff]  }
  0x88   :  { %554 = vmatprep.subr.bf16.mxu1 %v845_v0  ;;  %410 = vmatprep.subr.bf16.mxu0 %v598_v14  ;;  %v616_v25 = vld [vmem:[#allocation11 + $0x64] ss:$8 sps:$4 sm:$0xff]   ;;  %v614_v26 = vld [vmem:[#allocation11 + $0x60] ss:$8 sps:$4 sm:$0xff]   ;;  %v501_v27 = vld [vmem:[#allocation7] ss:$0 sm:$0xff]  ;;  %p786_p4 = pnand %p785_p3, %p779_p0 }
  0x89   :  { %v619_v35 = vld [vmem:[#allocation11 + $0x74] ss:$8 sps:$4 sm:$0xff]   ;;  %v617_v36 = vld [vmem:[#allocation11 + $0x70] ss:$8 sps:$4 sm:$0xff]   ;;  %v322_v48 = vsub.s32 0, %v321_v47  ;;  %v326_v50 = vsub.s32 1, %v321_v47 }
  0x8a   :  { %547 = vmatmul.mubr.msk.bf16.vlgmr.msra.gmra.mrb[0].mxu0 %vm143_vm1, %v119_v5  ;;  %v505_v38 = vld [vmem:[#allocation10] ss:$0 sm:$0xff]  ;;  %v318_v49 = vld [vmem:[#allocation13] sm:$0x3] }
  0x8b   :  { %555 = vmatpush3.bf16.msra.mxu1 %v590_v7  ;;  %411 = vmatpush1.bf16.msra.mxu0 %v596_v13  ;;  %v323_v51 = vrot.slane %v318_v49, %v322_v48  ;;  %v327_v52 = vrot.slane %v318_v49, %v326_v50 }
  0x8c   :  { %556 = vmatprep.subr.bf16.mxu1 %v845_v0  ;;  %412 = vmatprep.subr.bf16.mxu0 %v601_v15 }
  0x8d   :  { %442 = vmatprep.mubr.bf16.mxu0 %v847_v37 }
  0x8f   :  { %557 = vmatpush3.bf16.msra.mxu1 %v591_v8  ;;  %413 = vmatpush1.bf16.msra.mxu0 %v599_v16 }
  0x90   :  { %558 = vmatprep.subr.bf16.mxu1 %v845_v0  ;;  %414 = vmatprep.subr.bf16.mxu0 %v604_v17 }
  0x93   :  { %559 = vmatpush3.bf16.msra.mxu1 %v592_v9  ;;  %415 = vmatpush1.bf16.msra.mxu0 %v602_v18 }
  0x94   :  { %560 = vmatprep.subr.bf16.mxu1 %v845_v0  ;;  %416 = vmatprep.subr.bf16.mxu0 %v607_v19 }
  0x97   :  { %561 = vmatpush3.bf16.msra.mxu1 %v593_v10  ;;  %417 = vmatpush1.bf16.msra.mxu0 %v605_v20 }
  0x98   :  { %562 = vmatprep.subr.bf16.mxu1 %v845_v0  ;;  %418 = vmatprep.subr.bf16.mxu0 %v610_v21 }
  0x9b   :  { %563 = vmatpush3.bf16.msra.mxu1 %v594_v11  ;;  %419 = vmatpush1.bf16.msra.mxu0 %v608_v22 }
  0x9c   :  { %564 = vmatprep.subr.bf16.mxu1 %v845_v0  ;;  %420 = vmatprep.subr.bf16.mxu0 %v613_v23 }
  0x9f   :  { %565 = vmatpush3.bf16.msra.mxu1 %v595_v12  ;;  %421 = vmatpush1.bf16.msra.mxu0 %v611_v24 }
  0xa0   :  { %422 = vmatprep.subr.bf16.mxu0 %v616_v25 }
  0xa3   :  { %423 = vmatpush1.bf16.msra.mxu0 %v614_v26 }
  0xa4   :  { %424 = vmatprep.subr.bf16.mxu0 %v619_v35 }
  0xa7   :  { %425 = vmatpush1.bf16.msra.mxu0 %v617_v36 }
 0x15d   :  { %v181_v28 = vpop.f32.mrb[0].mxu0 }
 0x15e   :  { %v182_v29 = vadd.f32 %v501_v27, %v181_v28  ;;  %v548_v30 = vpop.f32.mrb[1].mxu0 }
 0x15f   :  { %v184_v31 = vpop.f32.mrb[2].mxu0 }
 0x160   :  { %v187_v32 = vmax.f32 %v182_v29, 0.0  ;;  %v549_v33 = vpop.f32.mrb[3].mxu0 }
 0x162   :  { %v188_v34 = vpack.c.bf16 %v187_v32, %v187_v32 }
 0x164   :  { %567 = vmatmul.mubr.bf16.vlgmr.msra.gmra.mrb[0].mxu1 %v188_v34 }
 0x237   :  { %v294_v39 = vpop.f32.mrb[0].mxu1 }
 0x238   :  { %v295_v40 = vadd.f32 %v505_v38, %v294_v39  ;;  %v568_v41 = vpop.f32.mrb[1].mxu1 }
 0x239   :  { %v297_v42 = vpop.f32.mrb[2].mxu1 }
 0x23a   :  { %v300_v43 = vmax.f32 %v295_v40, 0.0  ;;  %v569_v44 = vpop.f32.mrb[3].mxu1 }
 0x23c   :  { %v301_v45 = vpack.c.bf16 %v300_v43, %v300_v43 }
 0x23e   :  { %443 = vmatmul.mubr.bf16.vlgmr.msra.gmra.mrb[4].mxu0 %v301_v45 }
 0x311   :  { %v444_v53 = vpop.f32.mrb[4].mxu0 }
 0x312   :  { %v445_v54 = vadd.f32 %v444_v53, %v323_v51  ;;  %v446_v55 = vpop.f32.mrb[5].mxu0 }
 0x313   :  { %v447_v56 = vadd.f32 %v446_v55, %v327_v52  ;;  %v448_v57 = vpop.f32.mrb[6].mxu0 }
 0x314   :  { %467 = vst [vmem:[#allocation14] sm:$0xff] %v445_v54  ;;  %v449_v58 = vpop.f32.mrb[7].mxu0 }
 0x315   :  { %v452_v59 = vand.u32 2147483647, %v447_v56 }
 0x316   :  { %789 = shalt.err (!%p786_p4)
}
 0x317   :  { %s790_s21 = scalar_lea.hbm %s1010_s7, 128 }
 0x318   :  { %p791_p5 = scmp.ne.s32.totalorder %s1010_s7, %s790_s21  ;;  %p794_p6 = scmp.lt.u32.totalorder %s790_s21, %s1010_s7 }
 0x31a   :  { %p796_p7 = pnand %p794_p6, %p791_p5 }
 0x31c   :  { %799 = shalt.err (!%p796_p7)
}
 0x31d   :  { %478 = dma.vmem_to_hbm [thread:$0]  %s476_s15, 128, %s1010_s7, [#allocation4]   ;;  %v453_v60 = vsub.f32 0.0, %v452_v59  ;;  %v451_v6 = vmax.f32 %v447_v56, 0.0 }
 0x31e   :  { %s849_s1 = smov [#allocation15]  }
 0x31f   :  { %v454_v61 = vmul.f32 1.442695, %v453_v60  ;;  %s485_s28 = sshll.u32 %s849_s1, 4  ;;  %s486_s28 = int_to_ptr.vmem [resolvable:$true] %s485_s28 }
 0x320   :  { %s800_s7 = scalar_lea.vmem %s486_s28, 128  ;;  %p805_p9 = scmp.lt.s32.totalorder %s486_s28, %s486_s28 }
 0x321   :  { %620 = vpow2.f32 %v454_v61  ;;  %p801_p8 = scmp.ne.s32.totalorder %s486_s28, %s800_s7  ;;  %p806_p10 = scmp.lt.s32.totalorder %s800_s7, %s800_s7 }
 0x323   :  { %p807_p11 = por %p806_p10, %p805_p9 }
 0x325   :  { %p808_p12 = pnand %p807_p11, %p801_p8 }
 0x32b   :  { %v621_v62 = vpop.eup %620 }
 0x32c   :  { %v456_v63 = vadd.f32 1.0, %v621_v62  ;;  %v459_v0 = vmul.f32 -0.5, %v621_v62  ;;  %v462_v2 = vand.u32 2147483647, %v621_v62 }
 0x32e   :  { %622 = vlog2.f32 %v456_v63  ;;  %v460_v1 = vadd.f32 1.0, %v459_v0  ;;  %vm463_vm2 = vcmp.lt.f32.partialorder %v462_v2, 0.0004427343 }
 0x330   :  { %v461_v5 = vmul.f32 %v621_v62, %v460_v1 }
 0x338   :  { %v623_v3 = vpop.eup %622 }
 0x339   :  { %v458_v4 = vmul.f32 0.6931472, %v623_v3 }
 0x33b   :  { %v464_v7 = vsel %vm463_vm2, %v461_v5, %v458_v4 }
 0x33c   :  { %v465_v8 = vadd.f32 %v464_v7, %v451_v6 }
 0x33e   :  { %v466_v9 = vadd.f32 1e-07, %v465_v8 }
 0x340   :  { %468 = vst [vmem:[#allocation15] sm:$0xff] %v466_v9 }
 0x341   :  { %811 = shalt.err (!%p808_p12)
}
 0x342   :  { %s812_s25 = scalar_lea.hbm %s1011_s8, 128 }
 0x343   :  { %p813_p13 = scmp.ne.s32.totalorder %s1011_s8, %s812_s25  ;;  %p816_p0 = scmp.lt.u32.totalorder %s812_s25, %s1011_s8 }
 0x345   :  { %p818_p1 = pnand %p816_p0, %p813_p13 }
 0x347   :  { %821 = shalt.err (!%p818_p1)
}
 0x348   :  { %488 = dma.vmem_to_hbm [thread:$0]  %s486_s28, 128, %s1011_s8, [#allocation16]  }
 0x349   :  { %830 = dma.done.wait [#allocation4], 128  }
 0x34a   :  { %831 = vsyncadd [#allocation4], 4294967168 }
 0x34b   :  { %832 = dma.done.wait [#allocation16], 128  }
 0x34c   :  { %833 = vsyncadd [#allocation16], 4294967168 }
 0x34d   :  { %495 = vsyncpa [#allocation3], 1 }
 0x34e   :  { %496 = vsyncpa [#allocation6], 1 }
 0x34f   :  { %497 = vsyncpa [#allocation9], 1 }
 0x350   :  { %498 = vsyncpa [#allocation12], 1 }
 0x351   :  { %499 = vsyncpa [#allocation4], 1 }
 0x352   :  { %500 = vsyncpa [#allocation16], 1 }

</bundles_post_ra>
